<compile_context>
chip_gen: v5e
topology: v5e:2x2
jax: 0.10.0
libtpu: 0.0.40
codegen_flags: <defaults>
</compile_context>

<pallas_src>
import functools

import jax
import jax.numpy as jnp
from jax.experimental import pallas as pl
from jax.experimental.pallas import tpu as pltpu

A_DIM = 32               # emb_action features
S_DIM = 200              # enc_state features
IN_DIM = A_DIM + S_DIM   # 232  (Linear in_features)
OUT_DIM = 200            # Linear out_features
OUT_PAD = 256            # lane-dense padded output width (multiple of 128)


def forward_kernel(ea_ref, es_ref, w_ref, b_ref, o_ref):
    # ea_ref: [tb, 32]        es_ref: [tb, 200]
    # w_ref : [232, 256] bf16 (resident across the batch grid)
    # b_ref : [1, 256]  f32   o_ref : [tb, 256]
    ea = ea_ref[...].astype(jnp.bfloat16)
    es = es_ref[...].astype(jnp.bfloat16)
    # Static slices at row 32 are 8-sublane aligned -> free views, no VMEM copy.
    wa = w_ref[:A_DIM, :]          # [32, 256]
    ws = w_ref[A_DIM:IN_DIM, :]    # [200, 256]
    acc = b_ref[...] + jnp.dot(ea, wa, preferred_element_type=jnp.float32)
    acc = acc + jnp.dot(es, ws, preferred_element_type=jnp.float32)
    o_ref[...] = acc.astype(o_ref.dtype)


def prepare_params(weight, bias):
    """weight [232, 200] (already [in, out] layout), bias [200] ->
    bf16 weight [232, 256] and f32 bias [1, 256], padded lane-dense.
    Do this once at parameter-prep time."""
    w_pad = jnp.pad(weight, ((0, 0), (0, OUT_PAD - OUT_DIM))).astype(jnp.bfloat16)
    b_pad = jnp.pad(bias.astype(jnp.float32), (0, OUT_PAD - OUT_DIM)).reshape(1, OUT_PAD)
    return w_pad, b_pad


@functools.partial(jax.jit, static_argnames=("block_b",))
def forward(emb_action, enc_state, w_pad, b_pad, *, block_b=1024):
    """emb_action [B, 32], enc_state [B, 200] -> [B, 200]."""
    B = emb_action.shape[0]
    out_dtype = jnp.promote_types(emb_action.dtype, enc_state.dtype)

    # Batch tile: multiple of 8 sublanes, capped at block_b so double-buffered
    # activation/output tiles fit the v5e/v7x scoped-VMEM defaults.
    tb = min(block_b, max(8, ((B + 7) // 8) * 8))
    Bp = pl.cdiv(B, tb) * tb
    if Bp != B:
        pad = Bp - B
        emb_action = jnp.pad(emb_action, ((0, pad), (0, 0)))
        enc_state = jnp.pad(enc_state, ((0, pad), (0, 0)))

    out = pl.pallas_call(
        forward_kernel,
        out_shape=jax.ShapeDtypeStruct((Bp, OUT_PAD), out_dtype),
        grid=(Bp // tb,),
        in_specs=[
            pl.BlockSpec((tb, A_DIM), lambda i: (i, 0)),
            pl.BlockSpec((tb, S_DIM), lambda i: (i, 0)),
            pl.BlockSpec((IN_DIM, OUT_PAD), lambda i: (0, 0)),  # weights stay resident
            pl.BlockSpec((1, OUT_PAD), lambda i: (0, 0)),       # bias stays resident
        ],
        out_specs=pl.BlockSpec((tb, OUT_PAD), lambda i: (i, 0)),
        compiler_params=pltpu.CompilerParams(
            dimension_semantics=("parallel",),  # shard batch tiles across v7x's 2 TCs
        ),
    )(emb_action, enc_state, w_pad, b_pad)

    return out[:B, :OUT_DIM]


if __name__ == "__main__":
    key = jax.random.PRNGKey(0)
    k1, k2, k3, k4 = jax.random.split(key, 4)

    B = 8
    emb_action = jax.random.normal(k1, (B, A_DIM), dtype=jnp.float32)
    enc_state = jax.random.normal(k2, (B, S_DIM), dtype=jnp.float32)

    # Deterministic synthetic parameters (PyTorch Linear init is U(+/- 1/sqrt(232))).
    bound = 1.0 / jnp.sqrt(jnp.float32(IN_DIM))
    weight = jax.random.uniform(k3, (IN_DIM, OUT_DIM),
                                minval=-bound, maxval=bound, dtype=jnp.float32)
    bias = jax.random.uniform(k4, (OUT_DIM,),
                              minval=-bound, maxval=bound, dtype=jnp.float32)

    w_pad, b_pad = prepare_params(weight, bias)
    out = forward(emb_action, enc_state, w_pad, b_pad)
    out = jax.block_until_ready(out)

    # Reference (f32 cat + Linear); kernel uses bf16 matmul inputs with f32 accum,
    # so compare with a bf16-appropriate tolerance.
    ref = jnp.concatenate([emb_action, enc_state], axis=1) @ weight + bias
    assert out.shape == (B, OUT_DIM)
    assert jnp.allclose(out, ref, atol=3e-2, rtol=3e-2), float(jnp.max(jnp.abs(out - ref)))

    print("KERNEL_OK")
</pallas_src>

<mosaic_0001>
module attributes {stable_mosaic.version = 11 : i64} {
  func.func @forward_kernel(%arg0: i32, %arg1: memref<8x32xf32, #tpu.memory_space<vmem>>, %arg2: memref<8x200xf32, #tpu.memory_space<vmem>>, %arg3: memref<232x256xbf16, #tpu.memory_space<vmem>>, %arg4: memref<1x256xf32, #tpu.memory_space<vmem>>, %arg5: memref<8x256xf32, #tpu.memory_space<vmem>>) attributes {dimension_semantics = [#tpu.dimension_semantics<parallel>], iteration_bounds = array<i64: 1>, scalar_prefetch = 0 : i64, scratch_operands = 0 : i64, tpu.core_type = #tpu.core_type<tc>, window_params = [{transform_indices = @transform_0, window_bounds = array<i64: 8, 32>}, {transform_indices = @transform_1, window_bounds = array<i64: 8, 200>}, {pipeline_mode = #tpu.pipeline_mode<synchronous>, transform_indices = @transform_2, window_bounds = array<i64: 232, 256>}, {pipeline_mode = #tpu.pipeline_mode<synchronous>, transform_indices = @transform_3, window_bounds = array<i64: 1, 256>}, {transform_indices = @transform_4, window_bounds = array<i64: 8, 256>}]} {
    %c0 = arith.constant 0 : index
    %c0_0 = arith.constant 0 : index
    %0 = vector.load %arg1[%c0, %c0_0] : memref<8x32xf32, #tpu.memory_space<vmem>>, vector<8x32xf32>
    %1 = arith.truncf %0 : vector<8x32xf32> to vector<8x32xbf16>
    %c0_1 = arith.constant 0 : index
    %c0_2 = arith.constant 0 : index
    %2 = vector.load %arg2[%c0_1, %c0_2] : memref<8x200xf32, #tpu.memory_space<vmem>>, vector<8x200xf32>
    %3 = arith.truncf %2 : vector<8x200xf32> to vector<8x200xbf16>
    %c0_3 = arith.constant 0 : index
    %c0_4 = arith.constant 0 : index
    %4 = vector.load %arg3[%c0_3, %c0_4] : memref<232x256xbf16, #tpu.memory_space<vmem>>, vector<32x256xbf16>
    %c32 = arith.constant 32 : index
    %c0_5 = arith.constant 0 : index
    %5 = vector.load %arg3[%c32, %c0_5] : memref<232x256xbf16, #tpu.memory_space<vmem>>, vector<200x256xbf16>
    %c0_6 = arith.constant 0 : index
    %c0_7 = arith.constant 0 : index
    %6 = vector.load %arg4[%c0_6, %c0_7] : memref<1x256xf32, #tpu.memory_space<vmem>>, vector<1x256xf32>
    %cst = arith.constant dense<0.000000e+00> : vector<8x256xf32>
    %7 = tpu.matmul %1, %4, %cst {dimension_numbers = #tpu.dot_dimension_numbers<[1], [0], [0], [1], [0, 0, 1, 1], [], []>} : vector<8x32xbf16>, vector<32x256xbf16>, vector<8x256xf32> -> vector<8x256xf32>
    %8 = vector.broadcast %6 : vector<1x256xf32> to vector<8x256xf32>
    %9 = arith.addf %8, %7 : vector<8x256xf32>
    %cst_8 = arith.constant dense<0.000000e+00> : vector<8x256xf32>
    %10 = tpu.matmul %3, %5, %cst_8 {dimension_numbers = #tpu.dot_dimension_numbers<[1], [0], [0], [1], [0, 0, 1, 1], [], []>} : vector<8x200xbf16>, vector<200x256xbf16>, vector<8x256xf32> -> vector<8x256xf32>
    %11 = arith.addf %9, %10 : vector<8x256xf32>
    %c0_9 = arith.constant 0 : index
    %c0_10 = arith.constant 0 : index
    %12 = vector.load %arg5[%c0_9, %c0_10] : memref<8x256xf32, #tpu.memory_space<vmem>>, vector<8x256xf32>
    tpu.vector_store %arg5[%c0_9, %c0_10], %11 {strides = array<i32>} : memref<8x256xf32, #tpu.memory_space<vmem>>, vector<8x256xf32>,
    return
  }
  func.func @transform_0(%arg0: i32) -> (i32, i32) {
    %c0_i32 = arith.constant 0 : i32
    %c0_i32_0 = arith.constant 0 : i32
    return %arg0, %c0_i32 : i32, i32
  }
  func.func @transform_1(%arg0: i32) -> (i32, i32) {
    %c0_i32 = arith.constant 0 : i32
    %c0_i32_0 = arith.constant 0 : i32
    return %arg0, %c0_i32 : i32, i32
  }
  func.func @transform_2(%arg0: i32) -> (i32, i32) {
    %c0_i32 = arith.constant 0 : i32
    %c0_i32_0 = arith.constant 0 : i32
    %c0_i32_1 = arith.constant 0 : i32
    return %c0_i32, %c0_i32_0 : i32, i32
  }
  func.func @transform_3(%arg0: i32) -> (i32, i32) {
    %c0_i32 = arith.constant 0 : i32
    %c0_i32_0 = arith.constant 0 : i32
    %c0_i32_1 = arith.constant 0 : i32
    return %c0_i32, %c0_i32_0 : i32, i32
  }
  func.func @transform_4(%arg0: i32) -> (i32, i32) {
    %c0_i32 = arith.constant 0 : i32
    %c0_i32_0 = arith.constant 0 : i32
    return %arg0, %c0_i32 : i32, i32
  }
}

</mosaic_0001>

<bundles_post_ra>
// kernel: forward.1
= control target key start
LH: loop header
LB: loop body
LE: loop exit
PB: predicated region body
PF: predicated region fallthrough
CT: control target
= control target key end

     0   :  { %9 = vsyncpa [#allocation3], 0  ;;  %s667_s0 = inlined_call_operand.hbm [shape: f32[8,32], index: 0, kind: input, shape index: {}]   ;;  %s668_s1 = inlined_call_operand.hbm [shape: f32[8,200], index: 1, kind: input, shape index: {}]   ;;  %s669_s2 = inlined_call_operand.hbm [shape: bf16[232,256], index: 2, kind: input, shape index: {}]   ;;  %s670_s3 = inlined_call_operand.vmem [shape: f32[1,256], index: 3, kind: input, shape index: {}]   ;;  %s671_s4 = inlined_call_operand.hbm [shape: f32[8,256], index: 4, kind: output, shape index: {}]  }
   0x1   :  { %10 = vsyncpa [#allocation6], 0  ;;  %s28_s17 = sshll.u32 %s668_s1, 4  ;;  %s29_s17 = int_to_ptr.hbm [resolvable:$true] %s28_s17 }
   0x2   :  { %11 = vsyncpa [#allocation4], 0  ;;  %s617_s18 = smov [#allocation5]   ;;  %s17_s22 = sshll.u32 %s667_s0, 4  ;;  %s18_s22 = int_to_ptr.hbm [resolvable:$true] %s17_s22 }
   0x3   :  { %s30_s19 = sshll.u32 %s617_s18, 4  ;;  %s618_s23 = smov [#allocation2]   ;;  %s31_s19 = int_to_ptr.vmem [resolvable:$true] %s30_s19 }
   0x4   :  { %33 = dma.hbm_to_vmem [thread:$0]  %s29_s17, 256, %s31_s19, [#allocation6]  }
   0x5   :  { %s19_s24 = sshll.u32 %s618_s23, 4  ;;  %s38_s27 = sshll.u32 %s669_s2, 4  ;;  %s20_s24 = int_to_ptr.vmem [resolvable:$true] %s19_s24  ;;  %s39_s27 = int_to_ptr.hbm [resolvable:$true] %s38_s27 }
   0x6   :  { %22 = dma.hbm_to_vmem [thread:$0]  %s18_s22, 128, %s20_s24, [#allocation3]  }
   0x7   :  { %s619_s1 = smov [#allocation7]   ;;  %s620_s29 = smov 128  }
   0x8   :  { %s40_s28 = sshll.u32 %s619_s1, 4  ;;  %s621_s30 = smov 8   ;;  %s41_s28 = int_to_ptr.vmem [resolvable:$true] %s40_s28 }
   0x9   :  { %46 = dma.hbm_to_vmem [thread:$0]  %s39_s27, 3712, %s41_s28, [#allocation6], %s620_s29, %s620_s29, %s621_s30  }
   0xa   :  { %611 = dma.done.wait [#allocation3], 128  }
   0xb   :  { %612 = vsyncadd [#allocation3], 4294967168 }
   0xc   :  { %613 = dma.done.wait [#allocation6], 3968  }
   0xd   :  { %614 = vsyncadd [#allocation6], 4294963328  ;;  %v375_v0 = vld [vmem:[#allocation7 + $0x10] sm:$0xf]  ;;  %v484_v1 = vld [vmem:[#allocation7 + $0x14] sm:$0xf0] }
   0xe   :  { %v441_v2 = vld [vmem:[#allocation7 + $0x90] sm:$0xf]  ;;  %v376_v3 = vor.u32 %v484_v1, %v375_v0  ;;  %v500_v4 = vld [vmem:[#allocation7 + $0x94] sm:$0xf0]  ;;  %v499_v5 = vld [vmem:[#allocation7 + $0x94] sm:$0xf] }
   0xf   :  { %v443_v6 = vld [vmem:[#allocation7 + $0x98] sm:$0xf0]  ;;  %v442_v7 = vor.u32 %v500_v4, %v441_v2  ;;  %v367_v9 = vld [vmem:[#allocation7] sm:$0xf]  ;;  %v482_v10 = vld [vmem:[#allocation7 + $0x4] sm:$0xf0] }
  0x10   :  { %v446_v8 = vor.u32 %v499_v5, %v443_v6  ;;  %v433_v11 = vld [vmem:[#allocation7 + $0x80] sm:$0xf]  ;;  %128 = vmatpush.bf16.msra.mxu3 %v376_v3  ;;  %v368_v12 = vor.u32 %v482_v10, %v367_v9  ;;  %v498_v13 = vld [vmem:[#allocation7 + $0x84] sm:$0xf0]  ;;  %v497_v14 = vld [vmem:[#allocation7 + $0x84] sm:$0xf] }
  0x11   :  { %v435_v15 = vld [vmem:[#allocation7 + $0x88] sm:$0xf0]  ;;  %291 = vmatpush.bf16.msra.mxu2 %v442_v7  ;;  %v434_v16 = vor.u32 %v498_v13, %v433_v11  ;;  %v483_v18 = vld [vmem:[#allocation7 + $0x14] sm:$0xf]  ;;  %v377_v19 = vld [vmem:[#allocation7 + $0x18] sm:$0xf0] }
  0x12   :  { %317 = vmatpush.bf16.msra.mxu0 %v446_v8  ;;  %v438_v17 = vor.u32 %v497_v14, %v435_v15  ;;  %v96_v20 = vld [vmem:[#allocation7 + $0xe0] sm:$0xff]  ;;  %v380_v21 = vor.u32 %v483_v18, %v377_v19  ;;  %vm284_vm0 = vcmask 1043456   ;;  %v62_v23 = vld [vmem:[#allocation2] sm:$0xff]  ;;  %v425_v24 = vld [vmem:[#allocation7 + $0x70] sm:$0xf]  ;;  %vm118_vm1 = vcmask 261120  }
  0x13   :  { %v228_v22 = vunpack.c.l.b16 %v96_v20  ;;  %v496_v25 = vld [vmem:[#allocation7 + $0x74] sm:$0xf0]  ;;  %v229_v26 = vunpack.c.h.b16 %v96_v20  ;;  %v495_v27 = vld [vmem:[#allocation7 + $0x74] sm:$0xf]  ;;  %v427_v28 = vld [vmem:[#allocation7 + $0x78] sm:$0xf0]  ;;  %v63_v31 = vpack.c.bf16 %v62_v23, %v62_v23 }
  0x14   :  { %v481_v29 = vld [vmem:[#allocation7 + $0x4] sm:$0xf]  ;;  %129 = vmatpush.bf16.msra.mxu3 %v368_v12  ;;  %141 = vmatpush.bf16.msra.mxu1 %v380_v21  ;;  %v369_v32 = vld [vmem:[#allocation7 + $0x8] sm:$0xf0]  ;;  %v473_v33 = vld [vmem:[#allocation7 + $0xd0] sm:$0xf]  ;;  %v426_v36 = vor.u32 %v496_v25, %v425_v24  ;;  %v430_v37 = vor.u32 %v495_v27, %v427_v28 }
  0x15   :  { %v254_v30 = vpack.c.b16 %v228_v22, %v228_v22  ;;  %v508_v34 = vld [vmem:[#allocation7 + $0xd4] sm:$0xf0]  ;;  %v255_v35 = vpack.c.b16 %v229_v26, %v229_v26  ;;  %292 = vmatpush.bf16.msra.mxu2 %v434_v16  ;;  %v372_v38 = vor.u32 %v481_v29, %v369_v32  ;;  %v417_v39 = vld [vmem:[#allocation7 + $0x60] sm:$0xf]  ;;  %v494_v40 = vld [vmem:[#allocation7 + $0x64] sm:$0xf0] }
  0x16   :  { %318 = vmatpush.bf16.msra.mxu0 %v438_v17  ;;  %v493_v42 = vld [vmem:[#allocation7 + $0x64] sm:$0xf]  ;;  %v419_v43 = vld [vmem:[#allocation7 + $0x68] sm:$0xf0]  ;;  %v474_v44 = vor.u32 %v508_v34, %v473_v33  ;;  %v507_v46 = vld [vmem:[#allocation7 + $0xd4] sm:$0xf]  ;;  %v418_v50 = vor.u32 %v494_v40, %v417_v39 }
  0x17   :  { %v286_v41 = vsel %vm284_vm0, %v254_v30, 0  ;;  %v289_v45 = vsel %vm284_vm0, %v255_v35, 0  ;;  %v475_v47 = vld [vmem:[#allocation7 + $0xd8] sm:$0xf0]  ;;  %381 = vmatmul.msk.bf16.vlgmr.msra.gmra.mxu3 %vm118_vm1, %v63_v31  ;;  %v465_v48 = vld [vmem:[#allocation7 + $0xc0] sm:$0xf]  ;;  %v422_v51 = vor.u32 %v493_v42, %v419_v43 }
  0x18   :  { %307 = vmatpush.bf16.msrb.mxu3 %v286_v41  ;;  %142 = vmatpush.bf16.msra.mxu1 %v372_v38  ;;  %v506_v49 = vld [vmem:[#allocation7 + $0xc4] sm:$0xf0]  ;;  %v409_v52 = vld [vmem:[#allocation7 + $0x50] sm:$0xf]  ;;  %v478_v53 = vor.u32 %v507_v46, %v475_v47  ;;  %v492_v54 = vld [vmem:[#allocation7 + $0x54] sm:$0xf0] }
  0x19   :  { %293 = vmatpush.bf16.msra.mxu2 %v426_v36  ;;  %v491_v55 = vld [vmem:[#allocation7 + $0x54] sm:$0xf]  ;;  %v411_v56 = vld [vmem:[#allocation7 + $0x58] sm:$0xf0]  ;;  %v466_v57 = vor.u32 %v506_v49, %v465_v48  ;;  %v505_v58 = vld [vmem:[#allocation7 + $0xc4] sm:$0xf]  ;;  %v410_v62 = vor.u32 %v492_v54, %v409_v52 }
  0x1a   :  { %319 = vmatpush.bf16.msra.mxu0 %v430_v37  ;;  %v467_v59 = vld [vmem:[#allocation7 + $0xc8] sm:$0xf0]  ;;  %v457_v60 = vld [vmem:[#allocation7 + $0xb0] sm:$0xf]  ;;  %v504_v61 = vld [vmem:[#allocation7 + $0xb4] sm:$0xf0]  ;;  %v414_v63 = vor.u32 %v491_v55, %v411_v56 }
  0x1b   :  { %382 = vmatmul.msk.bf16.vlgmr.msra.gmra.mxu1 %vm118_vm1, %v63_v31  ;;  %v401_v0 = vld [vmem:[#allocation7 + $0x40] sm:$0xf]  ;;  %v470_v1 = vor.u32 %v505_v58, %v467_v59  ;;  %v490_v2 = vld [vmem:[#allocation7 + $0x44] sm:$0xf0]  ;;  %v489_v3 = vld [vmem:[#allocation7 + $0x44] sm:$0xf]  ;;  %v458_v5 = vor.u32 %v504_v61, %v457_v60 }
  0x1c   :  { %333 = vmatpush.bf16.msrb.mxu1 %v289_v45  ;;  %308 = vmatpush.bf16.msrb.mxu3 %v474_v44  ;;  %v403_v4 = vld [vmem:[#allocation7 + $0x48] sm:$0xf0]  ;;  %v503_v6 = vld [vmem:[#allocation7 + $0xb4] sm:$0xf]  ;;  %v459_v7 = vld [vmem:[#allocation7 + $0xb8] sm:$0xf0]  ;;  %v402_v10 = vor.u32 %v490_v2, %v401_v0 }
  0x1d   :  { %294 = vmatpush.bf16.msra.mxu2 %v418_v50  ;;  %v449_v8 = vld [vmem:[#allocation7 + $0xa0] sm:$0xf]  ;;  %v502_v9 = vld [vmem:[#allocation7 + $0xa4] sm:$0xf0]  ;;  %v406_v11 = vor.u32 %v489_v3, %v403_v4  ;;  %v393_v12 = vld [vmem:[#allocation7 + $0x30] sm:$0xf]  ;;  %v462_v13 = vor.u32 %v503_v6, %v459_v7 }
  0x1e   :  { %320 = vmatpush.bf16.msra.mxu0 %v422_v51  ;;  %v488_v14 = vld [vmem:[#allocation7 + $0x34] sm:$0xf0]  ;;  %v487_v15 = vld [vmem:[#allocation7 + $0x34] sm:$0xf]  ;;  %v395_v16 = vld [vmem:[#allocation7 + $0x38] sm:$0xf0]  ;;  %v450_v17 = vor.u32 %v502_v9, %v449_v8 }
  0x1f   :  { %v65_v18 = vld [vmem:[#allocation5 + $0x8] sm:$0xff]  ;;  %v501_v19 = vld [vmem:[#allocation7 + $0xa4] sm:$0xf]  ;;  %v451_v20 = vld [vmem:[#allocation7 + $0xa8] sm:$0xf0]  ;;  %v394_v21 = vor.u32 %v488_v14, %v393_v12  ;;  %v398_v22 = vor.u32 %v487_v15, %v395_v16  ;;  %vm280_vm2 = vcmask 588800  }
  0x20   :  { %334 = vmatpush.bf16.msrb.mxu1 %v478_v53  ;;  %309 = vmatpush.bf16.msrb.mxu3 %v466_v57  ;;  %v385_v23 = vld [vmem:[#allocation7 + $0x20] sm:$0xf]  ;;  %v67_v24 = vpack.c.bf16 %v65_v18, %v65_v18  ;;  %v454_v25 = vor.u32 %v501_v19, %v451_v20  ;;  %v486_v26 = vld [vmem:[#allocation7 + $0x24] sm:$0xf0]  ;;  %v485_v27 = vld [vmem:[#allocation7 + $0x24] sm:$0xf] }
  0x21   :  { %295 = vmatpush.bf16.msra.mxu2 %v410_v62  ;;  %v387_v28 = vld [vmem:[#allocation7 + $0x28] sm:$0xf0]  ;;  %v386_v29 = vor.u32 %v486_v26, %v385_v23  ;;  %v64_v31 = vld [vmem:[#allocation5] sm:$0xff]  ;;  %v97_v37 = vld [vmem:[%s670_s3] sm:$0x3]  ;;  %s622_s5 = smov [#allocation8]  }
  0x22   :  { %321 = vmatpush.bf16.msra.mxu0 %v414_v63  ;;  %v390_v30 = vor.u32 %v485_v27, %v387_v28  ;;  %v66_v32 = vpack.c.bf16 %v64_v31, %v64_v31  ;;  %v150_v38 = vperm.slane %v97_v37, 1  ;;  %v149_v44 = vperm.slane %v97_v37, 0  ;;  %s352_s6 = sshll.u32 %s622_s5, 4  ;;  %s354_s9 = sshll.u32 %s671_s4, 4  ;;  %s353_s6 = int_to_ptr.vmem [resolvable:$true] %s352_s6  ;;  %s355_s9 = int_to_ptr.hbm [resolvable:$true] %s354_s9 }
  0x24   :  { %335 = vmatpush.bf16.msrb.mxu1 %v470_v1  ;;  %310 = vmatpush.bf16.msrb.mxu3 %v458_v5 }
  0x25   :  { %296 = vmatpush.bf16.msra.mxu2 %v402_v10 }
  0x26   :  { %322 = vmatpush.bf16.msra.mxu0 %v406_v11 }
  0x28   :  { %336 = vmatpush.bf16.msrb.mxu1 %v462_v13  ;;  %311 = vmatpush.bf16.msrb.mxu3 %v450_v17 }
  0x29   :  { %297 = vmatpush.bf16.msra.mxu2 %v394_v21 }
  0x2a   :  { %323 = vmatpush.bf16.msra.mxu0 %v398_v22 }
  0x2b   :  { %479 = vmatmul.msk.bf16.vlgmr.msrb.gmra.mxu3 %vm280_vm2, %v67_v24 }
  0x2c   :  { %337 = vmatpush.bf16.msrb.mxu1 %v454_v25 }
  0x2d   :  { %298 = vmatpush.bf16.msra.mxu2 %v386_v29 }
  0x2e   :  { %324 = vmatpush.bf16.msra.mxu0 %v390_v30 }
  0x2f   :  { %480 = vmatmul.msk.bf16.vlgmr.msrb.gmra.mxu1 %vm280_vm2, %v67_v24 }
  0x30   :  { %299 = vmatmul.bf16.vlgmr.msra.gmra.mxu2 %v66_v32 }
  0x31   :  { %325 = vmatmul.bf16.vlgmr.msra.gmra.mxu0 %v66_v32 }
  0x98   :  { %v144_v33 = vpop.f32.mrf.mxu1 }
  0x99   :  { %v154_v42 = vadd.f32 %v150_v38, %v144_v33 }
  0x9a   :  { %v131_v34 = vpop.f32.mrf.mxu3 }
  0x9b   :  { %v153_v48 = vadd.f32 %v149_v44, %v131_v34 }
  0xa0   :  { %v146_v35 = vpop.f32.mrf.mxu1 }
  0xa2   :  { %v133_v36 = vpop.f32.mrf.mxu3 }
  0xac   :  { %v339_v39 = vpop.f32.mrf.mxu1 }
  0xae   :  { %v313_v40 = vpop.f32.mrf.mxu3  ;;  %v326_v41 = vpop.f32.mrf.mxu0 }
  0xaf   :  { %v340_v43 = vadd.f32 %v339_v39, %v326_v41 }
  0xb1   :  { %v344_v45 = vadd.f32 %v340_v43, %v154_v42 }
  0xb3   :  { %346 = vst [vmem:[#allocation8 + $0x8] sm:$0xff] %v344_v45  ;;  %v300_v46 = vpop.f32.mrf.mxu2 }
  0xb4   :  { %v341_v47 = vpop.f32.mrf.mxu1  ;;  %v314_v49 = vadd.f32 %v313_v40, %v300_v46 }
  0xb6   :  { %v315_v50 = vpop.f32.mrf.mxu3  ;;  %v328_v51 = vpop.f32.mrf.mxu0  ;;  %v343_v52 = vadd.f32 %v314_v49, %v153_v48 }
  0xb8   :  { %345 = vst [vmem:[#allocation8] sm:$0xff] %v343_v52 }
  0xb9   :  { %357 = dma.vmem_to_hbm [thread:$0]  %s353_s6, 256, %s355_s9, [#allocation4]  }
  0xbb   :  { %v302_v53 = vpop.f32.mrf.mxu2 }
  0xbc   :  { %615 = dma.done.wait [#allocation4], 256  }
  0xbd   :  { %616 = vsyncadd [#allocation4], 4294967040 }
  0xbe   :  { %362 = vsyncpa [#allocation3], 1 }
  0xbf   :  { %363 = vsyncpa [#allocation6], 1 }
  0xc0   :  { %364 = vsyncpa [#allocation4], 1 }

</bundles_post_ra>
